<compile_context>
chip_gen: v6e
topology: v6e:2x2x1
jax: 0.10.0
libtpu: 0.0.40
codegen_flags: <defaults>
</compile_context>

<pallas_src>
import jax
import jax.numpy as jnp
from jax.experimental import pallas as pl
from jax.experimental.pallas import tpu as pltpu

# ---------------- problem sizes (small, consistent with the module) ----------
N       = 4        # batch
C       = 4        # input channels
H = W   = 8        # spatial
HW      = H * W
D_MLP   = 32       # stand-in for ResNet-50 feature dim (2048)
DIM     = 16       # MoCo embedding dim
QUEUE_K = 128      # queue_size
MOMENTUM    = 0.999
TEMPERATURE = 0.07
INV_T       = 1.0 / TEMPERATURE

_VMEM = pl.BlockSpec(memory_space=pltpu.MemorySpace.VMEM)


# ---------------------------- fused Pallas kernel -----------------------------
def moco_fused_kernel(im_ref, pool_ref, wq_ref, wk_ref, pw_ref, pb_ref, queue_ref,
                      lpos_ref, lneg_ref, kout_ref, wk_new_ref):
    """Fused MoCo forward.
      im_ref:    (2N, C*HW)  stacked [im_q; im_k], channel-major flattened
      pool_ref:  (C*HW, C)   global-average-pool matrix (MXU pooling)
      wq_ref:    (C, D_MLP)  query encoder 1x1-conv weight (pre-transposed)
      wk_ref:    (C, D_MLP)  key encoder weight (pre-momentum-update)
      pw_ref:    (D_MLP, DIM) shared projection weight (pre-transposed)
      pb_ref:    (1, DIM)     shared projection bias
      queue_ref: (DIM, QUEUE_K)
    outputs:
      lpos_ref:   (N, 1)        l_pos / T
      lneg_ref:   (N, QUEUE_K)  l_neg / T   (lane-dense)
      kout_ref:   (N, DIM)      normalized key embeddings
      wk_new_ref: (C, D_MLP)    momentum-updated key encoder weight
    """
    f32 = jnp.float32

    # 1) momentum update of the key encoder weights (stays in vregs)
    wq = wq_ref[...]
    wk_new = MOMENTUM * wk_ref[...] + (1.0 - MOMENTUM) * wq
    wk_new_ref[...] = wk_new

    # 2) stand-in encoder: global-average-pool (MXU) + 1x1 conv + ReLU
    pooled = jnp.dot(im_ref[...], pool_ref[...], preferred_element_type=f32)  # (2N, C)
    feat_q = jnp.dot(pooled, wq, preferred_element_type=f32)                  # (2N, D_MLP)
    feat_k = jnp.dot(pooled, wk_new, preferred_element_type=f32)              # (2N, D_MLP)
    row = jax.lax.broadcasted_iota(jnp.int32, (2 * N, D_MLP), 0)
    feat = jnp.maximum(jnp.where(row < N, feat_q, feat_k), 0.0)               # ReLU

    # 3) normalize -> shared proj (single matmul over 2N rows) -> normalize
    def l2n(x):
        ss = jnp.sum(x * x, axis=1, keepdims=True)
        return x * jax.lax.rsqrt(jnp.maximum(ss, 1e-24))   # == x / max(||x||, 1e-12)

    feat = l2n(feat)
    proj = jnp.dot(feat, pw_ref[...], preferred_element_type=f32) + pb_ref[...]
    proj = l2n(proj)                                                           # (2N, DIM)
    q = proj[:N]
    k = proj[N:]

    # 4) contrastive logits, scaled by 1/T (constant multiply, no divide)
    lpos_ref[...] = jnp.sum(q * k, axis=1, keepdims=True) * INV_T
    lneg_ref[...] = jnp.dot(q, queue_ref[...], preferred_element_type=f32) * INV_T
    kout_ref[...] = k


# ------------------------------- MoCo forward --------------------------------
@jax.jit
def moco_forward(im_q, im_k, enc_q_w, enc_k_w, proj_w, proj_b, queue, queue_ptr):
    # stack query/key images so the whole batch flows through one kernel call
    im_both = jnp.concatenate(
        [im_q.reshape(N, C * HW), im_k.reshape(N, C * HW)], axis=0
    ).astype(jnp.float32)                                            # (2N, C*HW)

    # constant pooling matrix: mean over spatial per channel (constant-folded)
    pool_mat = jnp.repeat(jnp.eye(C, dtype=jnp.float32), HW, axis=0) / HW  # (C*HW, C)

    proj_w_t = proj_w.T                      # nn.Linear: y = x @ W.T + b
    proj_b2d = proj_b.reshape(1, DIM)

    l_pos, l_neg, k, enc_k_w_new = pl.pallas_call(
        moco_fused_kernel,
        out_shape=(
            jax.ShapeDtypeStruct((N, 1), jnp.float32),
            jax.ShapeDtypeStruct((N, QUEUE_K), jnp.float32),
            jax.ShapeDtypeStruct((N, DIM), jnp.float32),
            jax.ShapeDtypeStruct((C, D_MLP), jnp.float32),
        ),
        in_specs=[_VMEM] * 7,
        out_specs=(_VMEM, _VMEM, _VMEM, _VMEM),
    )(im_both, pool_mat, enc_q_w, enc_k_w, proj_w_t, proj_b2d, queue)

    # lane-dense kernel outputs; cheap concat done in the XLA wrapper
    logits = jnp.concatenate([l_pos, l_neg], axis=1)                 # (N, 1+K)
    labels = jnp.zeros((N,), dtype=jnp.int32)

    # dequeue_and_enqueue(k) at the CURRENT pointer (correctness fix).
    # TODO(synk): at production MoCo sizes (K~65536) do this in-kernel with
    # input_output_aliases + a masked column write instead of a full HBM copy.
    queue_new = jax.lax.dynamic_update_slice(queue, k.T, (0, queue_ptr[0]))
    queue_ptr_new = (queue_ptr + N) % QUEUE_K
    return logits, labels, queue_new, queue_ptr_new, enc_k_w_new


# ------------------------------ reference check -------------------------------
def _reference(im_q, im_k, enc_q_w, enc_k_w, proj_w, proj_b, queue, queue_ptr):
    def l2n(x):
        return x / jnp.maximum(jnp.linalg.norm(x, axis=1, keepdims=True), 1e-12)

    enc_k_w_new = MOMENTUM * enc_k_w + (1.0 - MOMENTUM) * enc_q_w

    def enc(im, w_cd):                        # w_cd: (C, D_MLP)
        pooled = im.reshape(N, C, HW).mean(axis=2)
        return jnp.maximum(pooled @ w_cd, 0.0)

    q = l2n(enc(im_q, enc_q_w))
    k = l2n(enc(im_k, enc_k_w_new))
    q = l2n(q @ proj_w.T + proj_b)
    k = l2n(k @ proj_w.T + proj_b)
    l_pos = jnp.sum(q * k, axis=1, keepdims=True)
    l_neg = q @ queue
    logits = jnp.concatenate([l_pos, l_neg], axis=1) / TEMPERATURE

    ptr = int(queue_ptr[0])
    queue_new = queue.at[:, ptr:ptr + N].set(k.T)
    return logits, queue_new, enc_k_w_new


# ----------------------------------- main -------------------------------------
if __name__ == "__main__":
    key = jax.random.PRNGKey(0)
    k_q1, k_k1, k_q2, k_k2, k_enc, k_pw, k_pb, k_queue = jax.random.split(key, 8)

    # encoder params, stored lane-dense as (C, D_MLP); key encoder = copy of query
    enc_q_w = jax.random.normal(k_enc, (C, D_MLP), dtype=jnp.float32) * 0.1
    enc_k_w = enc_q_w

    # shared proj head: nn.Linear(dim_mlp, dim)
    proj_w = jax.random.normal(k_pw, (DIM, D_MLP), dtype=jnp.float32) * 0.05
    proj_b = jax.random.normal(k_pb, (DIM,), dtype=jnp.float32) * 0.01

    # queue buffer: randn(dim, K) normalised along dim=0
    queue = jax.random.normal(k_queue, (DIM, QUEUE_K), dtype=jnp.float32)
    queue = queue / jnp.maximum(jnp.linalg.norm(queue, axis=0, keepdims=True), 1e-12)
    queue_ptr = jnp.zeros((1,), dtype=jnp.int32)

    # two steps: the second exercises the ptr != 0 enqueue path
    for kq, kk in [(k_q1, k_k1), (k_q2, k_k2)]:
        im_q = jax.random.normal(kq, (N, C, H, W), dtype=jnp.float32)
        im_k = jax.random.normal(kk, (N, C, H, W), dtype=jnp.float32)

        logits, labels, queue_new, queue_ptr_new, enc_k_w_new = jax.block_until_ready(
            moco_forward(im_q, im_k, enc_q_w, enc_k_w, proj_w, proj_b, queue, queue_ptr)
        )
        ref_logits, ref_queue, ref_enc_k = _reference(
            im_q, im_k, enc_q_w, enc_k_w, proj_w, proj_b, queue, queue_ptr)

        assert logits.shape == (N, 1 + QUEUE_K)
        assert labels.shape == (N,) and labels.dtype == jnp.int32
        assert jnp.allclose(logits, ref_logits, atol=1e-3, rtol=1e-3)
        assert jnp.allclose(queue_new, ref_queue, atol=1e-5)
        assert jnp.allclose(enc_k_w_new, ref_enc_k, atol=1e-6)

        # carry state forward (momentum-updated key encoder, queue, pointer)
        queue, queue_ptr, enc_k_w = queue_new, queue_ptr_new, enc_k_w_new

    print("KERNEL_OK")
</pallas_src>

<mosaic_0001>
module attributes {stable_mosaic.version = 11 : i64} {
  func.func @moco_fused_kernel(%arg0: memref<8x256xf32, #tpu.memory_space<vmem>>, %arg1: memref<256x4xf32, #tpu.memory_space<vmem>>, %arg2: memref<4x32xf32, #tpu.memory_space<vmem>>, %arg3: memref<4x32xf32, #tpu.memory_space<vmem>>, %arg4: memref<32x16xf32, #tpu.memory_space<vmem>>, %arg5: memref<1x16xf32, #tpu.memory_space<vmem>>, %arg6: memref<16x128xf32, #tpu.memory_space<vmem>>, %arg7: memref<4x1xf32, #tpu.memory_space<vmem>>, %arg8: memref<4x128xf32, #tpu.memory_space<vmem>>, %arg9: memref<4x16xf32, #tpu.memory_space<vmem>>, %arg10: memref<4x32xf32, #tpu.memory_space<vmem>>) attributes {dimension_semantics = [], scalar_prefetch = 0 : i64, scratch_operands = 0 : i64, tpu.core_type = #tpu.core_type<tc>} {
    %c0 = arith.constant 0 : index
    %c0_0 = arith.constant 0 : index
    %0 = vector.load %arg2[%c0, %c0_0] : memref<4x32xf32, #tpu.memory_space<vmem>>, vector<4x32xf32>
    %c0_1 = arith.constant 0 : index
    %c0_2 = arith.constant 0 : index
    %1 = vector.load %arg3[%c0_1, %c0_2] : memref<4x32xf32, #tpu.memory_space<vmem>>, vector<4x32xf32>
    %cst = arith.constant 9.990000e-01 : f32
    %2 = vector.broadcast %cst : f32 to vector<4x32xf32>
    %3 = arith.mulf %2, %1 : vector<4x32xf32>
    %cst_3 = arith.constant 1.000000e-03 : f32
    %4 = vector.broadcast %cst_3 : f32 to vector<4x32xf32>
    %5 = arith.mulf %4, %0 : vector<4x32xf32>
    %6 = arith.addf %3, %5 : vector<4x32xf32>
    %c0_4 = arith.constant 0 : index
    %c0_5 = arith.constant 0 : index
    %7 = vector.load %arg10[%c0_4, %c0_5] : memref<4x32xf32, #tpu.memory_space<vmem>>, vector<4x32xf32>
    tpu.vector_store %arg10[%c0_4, %c0_5], %6 {strides = array<i32>} : memref<4x32xf32, #tpu.memory_space<vmem>>, vector<4x32xf32>,
    %c0_6 = arith.constant 0 : index
    %c0_7 = arith.constant 0 : index
    %8 = vector.load %arg0[%c0_6, %c0_7] : memref<8x256xf32, #tpu.memory_space<vmem>>, vector<8x256xf32>
    %c0_8 = arith.constant 0 : index
    %c0_9 = arith.constant 0 : index
    %9 = vector.load %arg1[%c0_8, %c0_9] : memref<256x4xf32, #tpu.memory_space<vmem>>, vector<256x4xf32>
    %cst_10 = arith.constant dense<0.000000e+00> : vector<8x4xf32>
    %10 = tpu.matmul %8, %9, %cst_10 {dimension_numbers = #tpu.dot_dimension_numbers<[1], [0], [0], [1], [0, 0, 1, 1], [], []>} : vector<8x256xf32>, vector<256x4xf32>, vector<8x4xf32> -> vector<8x4xf32>
    %cst_11 = arith.constant dense<0.000000e+00> : vector<8x32xf32>
    %11 = tpu.matmul %10, %0, %cst_11 {dimension_numbers = #tpu.dot_dimension_numbers<[1], [0], [0], [1], [0, 0, 1, 1], [], []>} : vector<8x4xf32>, vector<4x32xf32>, vector<8x32xf32> -> vector<8x32xf32>
    %cst_12 = arith.constant dense<0.000000e+00> : vector<8x32xf32>
    %12 = tpu.matmul %10, %6, %cst_12 {dimension_numbers = #tpu.dot_dimension_numbers<[1], [0], [0], [1], [0, 0, 1, 1], [], []>} : vector<8x4xf32>, vector<4x32xf32>, vector<8x32xf32> -> vector<8x32xf32>
    %13 = tpu.iota {dimensions = array<i32: 0>} : vector<8x32xi32>
    %c4_i32 = arith.constant 4 : i32
    %14 = vector.broadcast %c4_i32 : i32 to vector<8x32xi32>
    %15 = arith.cmpi slt, %13, %14 : vector<8x32xi32>
    %16 = arith.select %15, %11, %12 : vector<8x32xi1>, vector<8x32xf32>
    %cst_13 = arith.constant 0.000000e+00 : f32
    %17 = vector.broadcast %cst_13 : f32 to vector<8x32xf32>
    %18 = arith.maximumf %16, %17 : vector<8x32xf32>
    %19 = arith.mulf %18, %18 : vector<8x32xf32>
    %cst_14 = arith.constant dense<0.000000e+00> : vector<8xf32>
    %20 = vector.multi_reduction <add>, %19, %cst_14 [1] : vector<8x32xf32> to vector<8xf32>
    %21 = vector.shape_cast %20 : vector<8xf32> to vector<8x1xf32>
    %cst_15 = arith.constant 1.000000e-24 : f32
    %22 = vector.broadcast %cst_15 : f32 to vector<8x1xf32>
    %23 = arith.maximumf %21, %22 : vector<8x1xf32>
    %24 = math.rsqrt %23 : vector<8x1xf32>
    %25 = vector.broadcast %24 : vector<8x1xf32> to vector<8x32xf32>
    %26 = arith.mulf %18, %25 : vector<8x32xf32>
    %c0_16 = arith.constant 0 : index
    %c0_17 = arith.constant 0 : index
    %27 = vector.load %arg4[%c0_16, %c0_17] : memref<32x16xf32, #tpu.memory_space<vmem>>, vector<32x16xf32>
    %cst_18 = arith.constant dense<0.000000e+00> : vector<8x16xf32>
    %28 = tpu.matmul %26, %27, %cst_18 {dimension_numbers = #tpu.dot_dimension_numbers<[1], [0], [0], [1], [0, 0, 1, 1], [], []>} : vector<8x32xf32>, vector<32x16xf32>, vector<8x16xf32> -> vector<8x16xf32>
    %c0_19 = arith.constant 0 : index
    %c0_20 = arith.constant 0 : index
    %29 = vector.load %arg5[%c0_19, %c0_20] : memref<1x16xf32, #tpu.memory_space<vmem>>, vector<1x16xf32>
    %30 = vector.broadcast %29 : vector<1x16xf32> to vector<8x16xf32>
    %31 = arith.addf %28, %30 : vector<8x16xf32>
    %32 = arith.mulf %31, %31 : vector<8x16xf32>
    %cst_21 = arith.constant dense<0.000000e+00> : vector<8xf32>
    %33 = vector.multi_reduction <add>, %32, %cst_21 [1] : vector<8x16xf32> to vector<8xf32>
    %34 = vector.shape_cast %33 : vector<8xf32> to vector<8x1xf32>
    %cst_22 = arith.constant 1.000000e-24 : f32
    %35 = vector.broadcast %cst_22 : f32 to vector<8x1xf32>
    %36 = arith.maximumf %34, %35 : vector<8x1xf32>
    %37 = math.rsqrt %36 : vector<8x1xf32>
    %38 = vector.broadcast %37 : vector<8x1xf32> to vector<8x16xf32>
    %39 = arith.mulf %31, %38 : vector<8x16xf32>
    %40 = vector.extract_strided_slice %39 {offsets = [0, 0], sizes = [4, 16], strides = [1, 1]} : vector<8x16xf32> to vector<4x16xf32>
    %41 = vector.extract_strided_slice %39 {offsets = [4, 0], sizes = [4, 16], strides = [1, 1]} : vector<8x16xf32> to vector<4x16xf32>
    %42 = arith.mulf %40, %41 : vector<4x16xf32>
    %cst_23 = arith.constant dense<0.000000e+00> : vector<4xf32>
    %43 = vector.multi_reduction <add>, %42, %cst_23 [1] : vector<4x16xf32> to vector<4xf32>
    %44 = vector.shape_cast %43 : vector<4xf32> to vector<4x1xf32>
    %cst_24 = arith.constant 14.2857141 : f32
    %45 = vector.broadcast %cst_24 : f32 to vector<4x1xf32>
    %46 = arith.mulf %44, %45 : vector<4x1xf32>
    %c0_25 = arith.constant 0 : index
    %c0_26 = arith.constant 0 : index
    %47 = vector.load %arg7[%c0_25, %c0_26] : memref<4x1xf32, #tpu.memory_space<vmem>>, vector<4x1xf32>
    tpu.vector_store %arg7[%c0_25, %c0_26], %46 {strides = array<i32>} : memref<4x1xf32, #tpu.memory_space<vmem>>, vector<4x1xf32>,
    %c0_27 = arith.constant 0 : index
    %c0_28 = arith.constant 0 : index
    %48 = vector.load %arg6[%c0_27, %c0_28] : memref<16x128xf32, #tpu.memory_space<vmem>>, vector<16x128xf32>
    %cst_29 = arith.constant dense<0.000000e+00> : vector<4x128xf32>
    %49 = tpu.matmul %40, %48, %cst_29 {dimension_numbers = #tpu.dot_dimension_numbers<[1], [0], [0], [1], [0, 0, 1, 1], [], []>} : vector<4x16xf32>, vector<16x128xf32>, vector<4x128xf32> -> vector<4x128xf32>
    %cst_30 = arith.constant 14.2857141 : f32
    %50 = vector.broadcast %cst_30 : f32 to vector<4x128xf32>
    %51 = arith.mulf %49, %50 : vector<4x128xf32>
    %c0_31 = arith.constant 0 : index
    %c0_32 = arith.constant 0 : index
    %52 = vector.load %arg8[%c0_31, %c0_32] : memref<4x128xf32, #tpu.memory_space<vmem>>, vector<4x128xf32>
    tpu.vector_store %arg8[%c0_31, %c0_32], %51 {strides = array<i32>} : memref<4x128xf32, #tpu.memory_space<vmem>>, vector<4x128xf32>,
    %c0_33 = arith.constant 0 : index
    %c0_34 = arith.constant 0 : index
    %53 = vector.load %arg9[%c0_33, %c0_34] : memref<4x16xf32, #tpu.memory_space<vmem>>, vector<4x16xf32>
    tpu.vector_store %arg9[%c0_33, %c0_34], %41 {strides = array<i32>} : memref<4x16xf32, #tpu.memory_space<vmem>>, vector<4x16xf32>,
    return
  }
}

</mosaic_0001>

<bundles_post_ra>
// kernel: moco_forward.1
= control target key start
LH: loop header
LB: loop body
LE: loop exit
PB: predicated region body
PF: predicated region fallthrough
CT: control target
= control target key end

     0   :  { %s845_s0 = inlined_call_operand.vmem [shape: f32[8,256], index: 0, kind: input, shape index: {}]   ;;  %s846_s1 = inlined_call_operand.vmem [shape: f32[256,4], index: 1, kind: input, shape index: {}]   ;;  %s847_s2 = inlined_call_operand.vmem [shape: f32[4,32], index: 2, kind: input, shape index: {}]   ;;  %s848_s3 = inlined_call_operand.vmem [shape: f32[4,32], index: 3, kind: input, shape index: {}]   ;;  %s849_s4 = inlined_call_operand.vmem [shape: f32[32,16], index: 4, kind: input, shape index: {}]   ;;  %s850_s5 = inlined_call_operand.vmem [shape: f32[1,16], index: 5, kind: input, shape index: {}]   ;;  %s851_s6 = inlined_call_operand.vmem [shape: f32[16,128], index: 6, kind: input, shape index: {}]   ;;  %s852_s7 = inlined_call_operand.vmem [shape: f32[4,1], index: 7, kind: output, shape index: {0}]   ;;  %s853_s8 = inlined_call_operand.vmem [shape: f32[4,128], index: 8, kind: output, shape index: {1}]   ;;  %s854_s9 = inlined_call_operand.vmem [shape: f32[4,16], index: 9, kind: output, shape index: {2}]   ;;  %s855_s10 = inlined_call_operand.hbm [shape: f32[4,32], index: 10, kind: output, shape index: {3}]  }
   0x1   :  { %v71_v0 = vld [vmem:[%s846_s1 + $0xf8] sm:$0xff]  ;;  %v70_v2 = vld [vmem:[%s846_s1 + $0xf0] sm:$0xff]  ;;  %v69_v4 = vld [vmem:[%s846_s1 + $0xe8] sm:$0xff] }
   0x2   :  { %v55_v1 = vld [vmem:[%s846_s1 + $0x78] sm:$0xff]  ;;  %520 = vmatprep.subr.mxu0 %v71_v0  ;;  %v54_v3 = vld [vmem:[%s846_s1 + $0x70] sm:$0xff]  ;;  %v53_v5 = vld [vmem:[%s846_s1 + $0x68] sm:$0xff] }
   0x3   :  { %521 = vmatpush3.msra.mxu0 %v55_v1  ;;  %v68_v6 = vld [vmem:[%s846_s1 + $0xe0] sm:$0xff]  ;;  %v67_v8 = vld [vmem:[%s846_s1 + $0xd8] sm:$0xff]  ;;  %v66_v10 = vld [vmem:[%s846_s1 + $0xd0] sm:$0xff] }
   0x4   :  { %522 = vmatprep.subr.mxu0 %v70_v2  ;;  %v52_v7 = vld [vmem:[%s846_s1 + $0x60] sm:$0xff]  ;;  %v51_v9 = vld [vmem:[%s846_s1 + $0x58] sm:$0xff]  ;;  %v50_v11 = vld [vmem:[%s846_s1 + $0x50] sm:$0xff] }
   0x5   :  { %523 = vmatpush3.msra.mxu0 %v54_v3  ;;  %v65_v12 = vld [vmem:[%s846_s1 + $0xc8] sm:$0xff] }
   0x6   :  { %524 = vmatprep.subr.mxu0 %v69_v4  ;;  %v39_v13 = vld [vmem:[%s845_s0 + $0x8] sm:$0xff] }
   0x7   :  { %525 = vmatpush3.msra.mxu0 %v53_v5  ;;  %v49_v14 = vld [vmem:[%s846_s1 + $0x48] sm:$0xff]  ;;  %136 = vmatprep.mubr.f32.mxu0 %v39_v13 }
   0x8   :  { %526 = vmatprep.subr.mxu0 %v68_v6 }
   0x9   :  { %527 = vmatpush3.msra.mxu0 %v52_v7 }
   0xa   :  { %528 = vmatprep.subr.mxu0 %v67_v8 }
   0xb   :  { %529 = vmatpush3.msra.mxu0 %v51_v9 }
   0xc   :  { %530 = vmatprep.subr.mxu0 %v66_v10 }
   0xd   :  { %16 = vsyncpa [#allocation3], 0  ;;  %531 = vmatpush3.msra.mxu0 %v50_v11  ;;  %v64_v15 = vld [vmem:[%s846_s1 + $0xc0] sm:$0xff]  ;;  %v63_v17 = vld [vmem:[%s846_s1 + $0xb8] sm:$0xff]  ;;  %v624_v34 = vmov 0.0   ;;  %vm146_vm0 = vcmask 1043456   ;;  %v293_v43 = vlaneseq }
   0xe   :  { %532 = vmatprep.subr.mxu0 %v65_v12  ;;  %v48_v16 = vld [vmem:[%s846_s1 + $0x40] sm:$0xff]  ;;  %v47_v18 = vld [vmem:[%s846_s1 + $0x38] sm:$0xff]  ;;  %v62_v19 = vld [vmem:[%s846_s1 + $0xb0] sm:$0xff]  ;;  %567 = vmatprep.subr.mxu1 %v624_v34  ;;  %vm625_vm1 = vmmov 0   ;;  %vm142_vm2 = vcmask 31744   ;;  %vm299_vm4 = vcmask 261120  }
   0xf   :  { %533 = vmatpush3.msra.mxu0 %v49_v14  ;;  %v46_v20 = vld [vmem:[%s846_s1 + $0x30] sm:$0xff]  ;;  %v61_v21 = vld [vmem:[%s846_s1 + $0xa8] sm:$0xff]  ;;  %v60_v23 = vld [vmem:[%s846_s1 + $0xa0] sm:$0xff]  ;;  %569 = vmatprep.mubr.msk.f32.mxu1 %vm625_vm1, %v624_v34  ;;  %v294_v44 = vshrl.u32 %v293_v43, 7  ;;  %vm391_vm5 = vcmask 130048   ;;  %vm485_vm6 = vcmask 130052  }
  0x10   :  { %534 = vmatprep.subr.mxu0 %v64_v15  ;;  %v45_v22 = vld [vmem:[%s846_s1 + $0x28] sm:$0xff]  ;;  %v44_v24 = vld [vmem:[%s846_s1 + $0x20] sm:$0xff]  ;;  %v59_v25 = vld [vmem:[%s846_s1 + $0x98] sm:$0xff]  ;;  %vm402_vm7 = vcmask 125952   ;;  %vm36_vm8 = vcmask 257024  }
  0x11   :  { %535 = vmatpush3.msra.mxu0 %v48_v16  ;;  %v43_v26 = vld [vmem:[%s846_s1 + $0x18] sm:$0xff]  ;;  %v58_v27 = vld [vmem:[%s846_s1 + $0x90] sm:$0xff]  ;;  %v57_v29 = vld [vmem:[%s846_s1 + $0x88] sm:$0xff]  ;;  %vm295_vm3 = vcmp.lt.s32.totalorder %v294_v44, 4 }
  0x12   :  { %536 = vmatprep.subr.mxu0 %v63_v17  ;;  %v42_v28 = vld [vmem:[%s846_s1 + $0x10] sm:$0xff]  ;;  %v41_v30 = vld [vmem:[%s846_s1 + $0x8] sm:$0xff]  ;;  %v56_v31 = vld [vmem:[%s846_s1 + $0x80] sm:$0xff] }
  0x13   :  { %537 = vmatpush3.msra.mxu0 %v47_v18  ;;  %v40_v32 = vld [vmem:[%s846_s1] sm:$0xff]  ;;  %v309_v53 = vld [vmem:[%s849_s4 + $0x18] sm:$0xff]  ;;  %v308_v54 = vld [vmem:[%s849_s4 + $0x10] sm:$0xff] }
  0x14   :  { %538 = vmatprep.subr.mxu0 %v62_v19  ;;  %v38_v33 = vld [vmem:[%s845_s0] sm:$0xff]  ;;  %v307_v55 = vld [vmem:[%s849_s4 + $0x8] sm:$0xff] }
  0x15   :  { %539 = vmatpush3.msra.mxu0 %v46_v20  ;;  %v31_v35 = vld [vmem:[%s847_s2] sm:$0xf]  ;;  %v410_v3 = vld [vmem:[%s851_s6 + $0x8] sm:$0xff] }
  0x16   :  { %540 = vmatprep.subr.mxu0 %v61_v21  ;;  %568 = vmatpush3.msk.msra.mxu1 %vm146_vm0, %v31_v35  ;;  %v32_v36 = vld [vmem:[%s848_s3] sm:$0xf]  ;;  %v34_v38 = vmul.f32 0.001, %v31_v35 }
  0x17   :  { %541 = vmatpush3.msra.mxu0 %v45_v22  ;;  %572 = vmatprep.subr.mxu1 %v624_v34  ;;  %v33_v37 = vmul.f32 0.999, %v32_v36  ;;  %v306_v56 = vld [vmem:[%s849_s4] sm:$0xff] }
  0x18   :  { %542 = vmatprep.subr.mxu0 %v60_v23  ;;  %v517_v61 = vld [vmem:[%s850_s5] ss:$0 sm:$0xff] }
  0x19   :  { %543 = vmatpush3.msra.mxu0 %v44_v24  ;;  %v794_v41 = vadd.f32 %v34_v38, %v33_v37  ;;  %v409_v4 = vld [vmem:[%s851_s6] sm:$0xff]  ;;  %s626_s6 = smov [#allocation2]  }
  0x1a   :  { %544 = vmatprep.subr.mxu0 %v59_v25  ;;  %s499_s15 = sshll.u32 %s626_s6, 4  ;;  %s500_s15 = int_to_ptr.vmem [resolvable:$true] %s499_s15 }
  0x1b   :  { %545 = vmatpush3.msra.mxu0 %v43_v26  ;;  %37 = vst.msk [vmem:[#allocation2] sm:$0xf] %vm36_vm8, %v794_v41  ;;  %s602_s16 = scalar_lea.vmem %s500_s15, 64  ;;  %p607_p1 = scmp.lt.s32.totalorder %s500_s15, %s500_s15 }
  0x1c   :  { %546 = vmatprep.subr.mxu0 %v58_v27  ;;  %p603_p0 = scmp.ne.s32.totalorder %s500_s15, %s602_s16  ;;  %p608_p2 = scmp.lt.s32.totalorder %s602_s16, %s602_s16 }
  0x1d   :  { %547 = vmatpush3.msra.mxu0 %v42_v28 }
  0x1e   :  { %548 = vmatprep.subr.mxu0 %v57_v29  ;;  %p609_p3 = por %p608_p2, %p607_p1 }
  0x1f   :  { %549 = vmatpush3.msra.mxu0 %v41_v30 }
  0x20   :  { %550 = vmatprep.subr.mxu0 %v56_v31  ;;  %p610_p4 = pnand %p609_p3, %p603_p0 }
  0x21   :  { %551 = vmatpush3.msra.mxu0 %v40_v32 }
  0x22   :  { %137 = vmatmul.mubr.f32.vlgmr.msra.gmra.mxu0 %v38_v33 }
  0xe2   :  { %v552_v39 = vpop.f32.mrf.mxu0 }
  0xe4   :  { %v553_v40 = vpop.f32.mrf.mxu0 }
  0xe5   :  { %v554_v42 = vadd.f32 %v553_v40, %v552_v39 }
  0xe7   :  { %570 = vmatmul.mubr.msk.f32.vlgmr.msra.gmra.mxu1 %vm142_vm2, %v554_v42 }
  0xe8   :  { %573 = vmatpush3.msk.msra.mxu1 %vm146_vm0, %v794_v41  ;;  %574 = vmatprep.mubr.msk.f32.mxu1 %vm625_vm1, %v624_v34 }
  0xe9   :  { %577 = vmatprep.subr.mxu1 %v624_v34 }
  0xeb   :  { %575 = vmatmul.mubr.msk.f32.vlgmr.msra.gmra.mxu1 %vm142_vm2, %v554_v42 }
  0xec   :  { %585 = vmatprep.mubr.msk.f32.mxu1 %vm625_vm1, %v624_v34  ;;  %578 = vmatpush3.msra.mxu1 %v309_v53 }
  0xed   :  { %579 = vmatprep.subr.mxu1 %v624_v34 }
  0xee   :  { %580 = vmatpush3.msra.mxu1 %v308_v54 }
  0xef   :  { %581 = vmatprep.subr.mxu1 %v624_v34 }
  0xf0   :  { %582 = vmatpush3.msra.mxu1 %v307_v55 }
  0xf1   :  { %583 = vmatprep.subr.mxu1 %v624_v34 }
  0xf2   :  { %584 = vmatpush3.msra.mxu1 %v306_v56 }
  0xf3   :  { %588 = vmatprep.subr.mxu1 %v624_v34 }
 0x1a7   :  { %v216_v45 = vpop.f32.mrf.mxu1 }
 0x1a9   :  { %v571_v46 = vpop.f32.mrf.mxu1 }
 0x1ab   :  { %v289_v47 = vpop.f32.mrf.mxu1 }
 0x1ac   :  { %v296_v48 = vsel %vm295_vm3, %v216_v45, %v289_v47 }
 0x1ad   :  { %v297_v49 = vmax.f32 %v296_v48, 0.0  ;;  %v576_v50 = vpop.f32.mrf.mxu1 }
 0x1af   :  { %v298_v51 = vmul.f32 %v297_v49, %v297_v49 }
 0x1b1   :  { %v300_v52 = vsel %vm299_vm4, %v298_v51, 0.0 }
 0x1b2   :  { %301 = vadd.xlane.f32.xlu0 %v300_v52 }
 0x23b   :  { %v302_v57 = vpop.xlane.xlu0 %301 }
 0x23c   :  { %v303_v58 = vmax.f32 %v302_v57, 1e-24 }
 0x23e   :  { %598 = vrsqrt.f32 %v303_v58 }
 0x24b   :  { %v599_v59 = vpop.eup %598 }
 0x24c   :  { %v305_v60 = vmul.f32 %v599_v59, %v297_v49 }
 0x24e   :  { %586 = vmatmul.mubr.msk.f32.vlgmr.msra.gmra.mxu1 %vm299_vm4, %v305_v60 }
 0x24f   :  { %592 = vmatprep.mubr.msk.f32.mxu1 %vm625_vm1, %v624_v34  ;;  %589 = vmatpush3.msra.mxu1 %v410_v3 }
 0x250   :  { %590 = vmatprep.subr.mxu1 %v624_v34 }
 0x251   :  { %591 = vmatpush3.msra.mxu1 %v409_v4 }
 0x30e   :  { %v386_v62 = vpop.f32.mrf.mxu1 }
 0x30f   :  { %v387_v63 = vadd.f32 %v517_v61, %v386_v62 }
 0x310   :  { %v587_v0 = vpop.f32.mrf.mxu1 }
 0x311   :  { %v390_v1 = vmul.f32 %v387_v63, %v387_v63 }
 0x313   :  { %v392_v2 = vsel %vm391_vm5, %v390_v1, 0.0 }
 0x314   :  { %393 = vadd.xlane.f32.xlu0 %v392_v2 }
 0x39d   :  { %v394_v5 = vpop.xlane.xlu0 %393 }
 0x39e   :  { %v395_v6 = vmax.f32 %v394_v5, 1e-24 }
 0x3a0   :  { %600 = vrsqrt.f32 %v395_v6 }
 0x3ad   :  { %v601_v7 = vpop.eup %600 }
 0x3ae   :  { %v397_v8 = vmul.f32 %v601_v7, %v387_v63 }
 0x3b0   :  { %593 = vmatmul.mubr.msk.f32.vlgmr.msra.gmra.mxu1 %vm391_vm5, %v397_v8  ;;  %486 = vst.msk [vmem:[%s854_s9 - $0x4] sm:$0xf0] %vm485_vm6, %v397_v8  ;;  %v399_v9 = vrot.slane %v397_v8, 4 }
 0x3b2   :  { %v401_v10 = vmul.f32 %v399_v9, %v397_v8 }
 0x3b4   :  { %v403_v11 = vsel %vm402_vm7, %v401_v10, 0.0 }
 0x3b5   :  { %404 = vadd.xlane.f32.xlu1 %v403_v11 }
 0x3b6   :  { %613 = shalt.err (!%p610_p4)
}
 0x3b7   :  { %502 = dma.vmem_to_hbm [thread:$0]  %s500_s15, 64, %s855_s10, [#allocation3]   ;;  %vm407_vm9 = vcmask 3072  }
 0x43e   :  { %v405_v12 = vpop.xlane.xlu1 %404 }
 0x43f   :  { %v406_v13 = vmul.f32 14.285714, %v405_v12 }
 0x441   :  { %408 = vst.msk [vmem:[%s852_s7] sm:$0xf] %vm407_vm9, %v406_v13 }
 0x470   :  { %v479_v14 = vpop.f32.mrf.mxu1 }
 0x471   :  { %v483_v15 = vmul.f32 14.285714, %v479_v14 }
 0x472   :  { %v594_v16 = vpop.f32.mrf.mxu1 }
 0x473   :  { %484 = vst [vmem:[%s853_s8] sm:$0xf] %v483_v15 }
 0x474   :  { %622 = dma.done.wait [#allocation3], 64  }
 0x475   :  { %623 = vsyncadd [#allocation3], 4294967232 }
 0x476   :  { %512 = vsyncpa [#allocation3], 1 }

</bundles_post_ra>
